<compile_context>
chip_gen: v7x
topology: tpu7x:2x2x1
jax: 0.10.0
libtpu: 0.0.40
codegen_flags: <defaults>
</compile_context>

<pallas_src>
import jax
import jax.numpy as jnp
from jax.experimental import pallas as pl
from jax.experimental.pallas import tpu as pltpu


def gru_tanh_kernel(z_tm_ref, x2d_ref, w_ih_ref, w_hh_ref, b_gi_ref, b_hn_ref,
                    out_ref):
    """Fused GRU + tanh(out + x), single invocation (no grid).

    z_tm_ref : (T*B, H)    GRU input, TIME-MAJOR flattened (row t*B+b = z[b,t])
    x2d_ref  : (B, T*H)    residual, row-major flattened over (T, H)
    w_ih_ref : (H, 3*GP)   input->gates weights, gate order (r, z, n),
                           each gate padded to a 128-lane pitch GP
    w_hh_ref : (H, 3*GP)   hidden->gates weights, same padded layout
    b_gi_ref : (1, 3*GP)   b_ih + [b_hh_r, b_hh_z, 0]  (folded, gate-padded)
    b_hn_ref : (1, H)      b_hh_n (must stay inside the r * (...) term)
    out_ref  : (B, T*H)    tanh(gru_out + x), row-major flattened over (T, H)
    """
    _, H = z_tm_ref.shape
    B, TH = out_ref.shape
    T = TH // H
    gp = w_hh_ref.shape[1] // 3          # gate pitch (multiple of 128 lanes)

    w_hh = w_hh_ref[...]                                   # (H, 3*GP)
    # Hoist the broadcast out of the loop (broadcast_in_dim is not CSE'd).
    b_hn = jnp.broadcast_to(b_hn_ref[...], (B, H))         # (B, H)

    # --- Hoisted input projection for ALL (t, b): ONE MXU matmul, ONE bias add.
    gi = (jnp.dot(z_tm_ref[...], w_ih_ref[...],
                  preferred_element_type=jnp.float32)
          + b_gi_ref[...])                                 # (T*B, 3*GP)

    # --- Sequential GRU recurrence; T is small & static -> fully unrolled,
    # hidden state carried in vregs.  Only h @ W_hh is on the serial path.
    h = jnp.zeros((B, H), jnp.float32)
    outs = []
    for t in range(T):
        # Step-t input-gate block: one contiguous static slice (no gather).
        gi_t = gi[t * B:(t + 1) * B, :]                    # (B, 3*GP)
        # Single fused hidden projection per step: (B, H) @ (H, 3*GP).
        gh = jnp.dot(h, w_hh, preferred_element_type=jnp.float32)

        # Gate slices start at 128-lane (vreg) boundaries -> no lane rotates.
        r = jax.nn.sigmoid(gi_t[:, 0:H] + gh[:, 0:H])
        zg = jax.nn.sigmoid(gi_t[:, gp:gp + H] + gh[:, gp:gp + H])
        n = jnp.tanh(gi_t[:, 2 * gp:2 * gp + H]
                     + r * (gh[:, 2 * gp:2 * gp + H] + b_hn))
        h = (1.0 - zg) * n + zg * h
        outs.append(h)

    # Lane-dense assembly: (B, T*H) matches row-major (B, T, H); one store.
    out_seq = jnp.concatenate(outs, axis=-1)               # (B, T*H)
    out_ref[...] = jnp.tanh(out_seq + x2d_ref[...])


def _pad_gates(w3, H, gp):
    """Re-lay (.., 3H) gate-packed arrays as (.., 3*gp) with each gate starting
    at a 128-lane-aligned column (gate order r, z, n). No-op if gp == H."""
    if gp == H:
        return w3
    pad = jnp.zeros(w3.shape[:-1] + (gp - H,), w3.dtype)
    r, z, n = w3[..., :H], w3[..., H:2 * H], w3[..., 2 * H:]
    return jnp.concatenate([r, pad, z, pad, n, pad], axis=-1)


def func_forward(z, x, w_ih, w_hh, b_ih, b_hh):
    """z, x: (B, T, H) float32 (batch_first).  Returns tanh(GRU(z).out + x).

    w_ih, w_hh: (H, 3H) pre-transposed GRU weights (PyTorch gate order r, z, n;
                i.e. weight_ih_l0.T / weight_hh_l0.T).
    b_ih, b_hh: (3H,) biases (gate order r, z, n).
    """
    B, T, H = z.shape
    assert w_ih.shape == (H, 3 * H) and w_hh.shape == (H, 3 * H), \
        "pass weights pre-transposed to (H, 3H)"
    gp = ((H + 127) // 128) * 128        # 128-lane gate pitch

    # Fold every bias except b_hh[n] (scaled by r inside the cell) into the
    # hoisted input projection.
    b_gi = (b_ih + jnp.concatenate([b_hh[:2 * H],
                                    jnp.zeros((H,), b_hh.dtype)])
            ).reshape(1, 3 * H).astype(jnp.float32)
    b_hn = b_hh[2 * H:].reshape(1, H).astype(jnp.float32)

    # Gate-pad weights/biases so each gate is 128-lane aligned in the kernel.
    w_ih_p = _pad_gates(w_ih.astype(jnp.float32), H, gp)   # (H, 3*gp)
    w_hh_p = _pad_gates(w_hh.astype(jnp.float32), H, gp)   # (H, 3*gp)
    b_gi_p = _pad_gates(b_gi, H, gp)                       # (1, 3*gp)

    # Time-major flatten of z: row t*B + b == z[b, t, :] (enables a single
    # hoisted projection matmul and contiguous per-step slices in the kernel).
    z_tm = jnp.transpose(z, (1, 0, 2)).reshape(T * B, H)
    # Free row-major reshape (bitcast) of the residual.
    x2d = x.reshape(B, T * H)

    vmem = pl.BlockSpec(memory_space=pltpu.MemorySpace.VMEM)
    out2d = pl.pallas_call(
        gru_tanh_kernel,
        out_shape=jax.ShapeDtypeStruct((B, T * H), jnp.float32),
        in_specs=[vmem] * 6,
        out_specs=vmem,
    )(z_tm, x2d, w_ih_p, w_hh_p, b_gi_p, b_hn)

    return out2d.reshape(B, T, H)        # free bitcast back to (B, T, H)


def gru_tanh_reference(z, x, w_ih, w_hh, b_ih, b_hh):
    """Pure-JAX reference with PyTorch GRU semantics (for verification)."""
    B, T, H = z.shape
    h0 = jnp.zeros((B, H), jnp.float32)

    def step(h, zt):
        gi = zt @ w_ih + b_ih                      # (B, 3H)
        gh = h @ w_hh + b_hh                       # (B, 3H)
        r = jax.nn.sigmoid(gi[:, :H] + gh[:, :H])
        zg = jax.nn.sigmoid(gi[:, H:2 * H] + gh[:, H:2 * H])
        n = jnp.tanh(gi[:, 2 * H:] + r * gh[:, 2 * H:])
        h_new = (1.0 - zg) * n + zg * h
        return h_new, h_new

    _, outs = jax.lax.scan(step, h0, jnp.transpose(z, (1, 0, 2)))
    return jnp.tanh(jnp.transpose(outs, (1, 0, 2)) + x)


if __name__ == "__main__":
    # Small shapes consistent with the module: batch=2, seq=8, hidden=32.
    # NOTE: at this size the kernel is dominated by fixed launch/DMA overhead;
    # the structural optimizations only become visible at larger T/H.
    B, T, H = 2, 8, 32
    key = jax.random.PRNGKey(0)
    kz, kx, k1, k2, k3, k4 = jax.random.split(key, 6)

    z = jax.random.normal(kz, (B, T, H), jnp.float32)
    x = jax.random.normal(kx, (B, T, H), jnp.float32)

    # Deterministic GRU parameters (PyTorch-style uniform(-1/sqrt(H), 1/sqrt(H))),
    # stored pre-transposed as (H, 3H), gate order (r, z, n); biases (3H,).
    s = 1.0 / jnp.sqrt(jnp.float32(H))
    w_ih = jax.random.uniform(k1, (H, 3 * H), jnp.float32, -s, s)
    w_hh = jax.random.uniform(k2, (H, 3 * H), jnp.float32, -s, s)
    b_ih = jax.random.uniform(k3, (3 * H,), jnp.float32, -s, s)
    b_hh = jax.random.uniform(k4, (3 * H,), jnp.float32, -s, s)

    out = jax.jit(func_forward)(z, x, w_ih, w_hh, b_ih, b_hh)
    out = jax.block_until_ready(out)

    ref = gru_tanh_reference(z, x, w_ih, w_hh, b_ih, b_hh)
    assert out.shape == (B, T, H)
    assert jnp.allclose(out, ref, atol=2e-5, rtol=2e-5), \
        float(jnp.max(jnp.abs(out - ref)))

    print("KERNEL_OK")
</pallas_src>

<mosaic_0001>
module attributes {stable_mosaic.version = 11 : i64} {
  func.func @gru_tanh_kernel(%arg0: memref<16x32xf32, #tpu.memory_space<vmem>>, %arg1: memref<2x256xf32, #tpu.memory_space<vmem>>, %arg2: memref<32x384xf32, #tpu.memory_space<vmem>>, %arg3: memref<32x384xf32, #tpu.memory_space<vmem>>, %arg4: memref<1x384xf32, #tpu.memory_space<vmem>>, %arg5: memref<1x32xf32, #tpu.memory_space<vmem>>, %arg6: memref<2x256xf32, #tpu.memory_space<vmem>>) attributes {dimension_semantics = [], scalar_prefetch = 0 : i64, scratch_operands = 0 : i64, tpu.core_type = #tpu.core_type<tc>} {
    %c0 = arith.constant 0 : index
    %c0_0 = arith.constant 0 : index
    %0 = vector.load %arg3[%c0, %c0_0] : memref<32x384xf32, #tpu.memory_space<vmem>>, vector<32x384xf32>
    %c0_1 = arith.constant 0 : index
    %c0_2 = arith.constant 0 : index
    %1 = vector.load %arg5[%c0_1, %c0_2] : memref<1x32xf32, #tpu.memory_space<vmem>>, vector<1x32xf32>
    %2 = vector.shape_cast %1 : vector<1x32xf32> to vector<1x32xf32>
    %3 = vector.broadcast %2 : vector<1x32xf32> to vector<2x32xf32>
    %c0_3 = arith.constant 0 : index
    %c0_4 = arith.constant 0 : index
    %4 = vector.load %arg0[%c0_3, %c0_4] : memref<16x32xf32, #tpu.memory_space<vmem>>, vector<16x32xf32>
    %c0_5 = arith.constant 0 : index
    %c0_6 = arith.constant 0 : index
    %5 = vector.load %arg2[%c0_5, %c0_6] : memref<32x384xf32, #tpu.memory_space<vmem>>, vector<32x384xf32>
    %cst = arith.constant dense<0.000000e+00> : vector<16x384xf32>
    %6 = tpu.matmul %4, %5, %cst {dimension_numbers = #tpu.dot_dimension_numbers<[1], [0], [0], [1], [0, 0, 1, 1], [], []>} : vector<16x32xf32>, vector<32x384xf32>, vector<16x384xf32> -> vector<16x384xf32>
    %c0_7 = arith.constant 0 : index
    %c0_8 = arith.constant 0 : index
    %7 = vector.load %arg4[%c0_7, %c0_8] : memref<1x384xf32, #tpu.memory_space<vmem>>, vector<1x384xf32>
    %8 = vector.broadcast %7 : vector<1x384xf32> to vector<16x384xf32>
    %9 = arith.addf %6, %8 : vector<16x384xf32>
    %cst_9 = arith.constant 0.000000e+00 : f32
    %10 = vector.broadcast %cst_9 : f32 to vector<2x32xf32>
    %11 = vector.extract_strided_slice %9 {offsets = [0, 0], sizes = [2, 384], strides = [1, 1]} : vector<16x384xf32> to vector<2x384xf32>
    %cst_10 = arith.constant dense<0.000000e+00> : vector<2x384xf32>
    %12 = tpu.matmul %10, %0, %cst_10 {dimension_numbers = #tpu.dot_dimension_numbers<[1], [0], [0], [1], [0, 0, 1, 1], [], []>} : vector<2x32xf32>, vector<32x384xf32>, vector<2x384xf32> -> vector<2x384xf32>
    %13 = vector.extract_strided_slice %11 {offsets = [0, 0], sizes = [2, 32], strides = [1, 1]} : vector<2x384xf32> to vector<2x32xf32>
    %14 = vector.extract_strided_slice %12 {offsets = [0, 0], sizes = [2, 32], strides = [1, 1]} : vector<2x384xf32> to vector<2x32xf32>
    %15 = arith.addf %13, %14 : vector<2x32xf32>
    %16 = arith.negf %15 : vector<2x32xf32>
    %17 = math.exp %16 : vector<2x32xf32>
    %cst_11 = arith.constant 1.000000e+00 : f32
    %18 = vector.broadcast %cst_11 : f32 to vector<2x32xf32>
    %19 = arith.addf %18, %17 : vector<2x32xf32>
    %20 = arith.divf %18, %19 : vector<2x32xf32>
    %21 = vector.extract_strided_slice %11 {offsets = [0, 128], sizes = [2, 32], strides = [1, 1]} : vector<2x384xf32> to vector<2x32xf32>
    %22 = vector.extract_strided_slice %12 {offsets = [0, 128], sizes = [2, 32], strides = [1, 1]} : vector<2x384xf32> to vector<2x32xf32>
    %23 = arith.addf %21, %22 : vector<2x32xf32>
    %24 = arith.negf %23 : vector<2x32xf32>
    %25 = math.exp %24 : vector<2x32xf32>
    %cst_12 = arith.constant 1.000000e+00 : f32
    %26 = vector.broadcast %cst_12 : f32 to vector<2x32xf32>
    %27 = arith.addf %26, %25 : vector<2x32xf32>
    %28 = arith.divf %26, %27 : vector<2x32xf32>
    %29 = vector.extract_strided_slice %11 {offsets = [0, 256], sizes = [2, 32], strides = [1, 1]} : vector<2x384xf32> to vector<2x32xf32>
    %30 = vector.extract_strided_slice %12 {offsets = [0, 256], sizes = [2, 32], strides = [1, 1]} : vector<2x384xf32> to vector<2x32xf32>
    %31 = arith.addf %30, %3 : vector<2x32xf32>
    %32 = arith.mulf %20, %31 : vector<2x32xf32>
    %33 = arith.addf %29, %32 : vector<2x32xf32>
    %34 = math.tanh %33 : vector<2x32xf32>
    %cst_13 = arith.constant 1.000000e+00 : f32
    %35 = vector.broadcast %cst_13 : f32 to vector<2x32xf32>
    %36 = arith.subf %35, %28 : vector<2x32xf32>
    %37 = arith.mulf %36, %34 : vector<2x32xf32>
    %38 = arith.mulf %28, %10 : vector<2x32xf32>
    %39 = arith.addf %37, %38 : vector<2x32xf32>
    %40 = vector.extract_strided_slice %9 {offsets = [2, 0], sizes = [2, 384], strides = [1, 1]} : vector<16x384xf32> to vector<2x384xf32>
    %cst_14 = arith.constant dense<0.000000e+00> : vector<2x384xf32>
    %41 = tpu.matmul %39, %0, %cst_14 {dimension_numbers = #tpu.dot_dimension_numbers<[1], [0], [0], [1], [0, 0, 1, 1], [], []>} : vector<2x32xf32>, vector<32x384xf32>, vector<2x384xf32> -> vector<2x384xf32>
    %42 = vector.extract_strided_slice %40 {offsets = [0, 0], sizes = [2, 32], strides = [1, 1]} : vector<2x384xf32> to vector<2x32xf32>
    %43 = vector.extract_strided_slice %41 {offsets = [0, 0], sizes = [2, 32], strides = [1, 1]} : vector<2x384xf32> to vector<2x32xf32>
    %44 = arith.addf %42, %43 : vector<2x32xf32>
    %45 = arith.negf %44 : vector<2x32xf32>
    %46 = math.exp %45 : vector<2x32xf32>
    %cst_15 = arith.constant 1.000000e+00 : f32
    %47 = vector.broadcast %cst_15 : f32 to vector<2x32xf32>
    %48 = arith.addf %47, %46 : vector<2x32xf32>
    %49 = arith.divf %47, %48 : vector<2x32xf32>
    %50 = vector.extract_strided_slice %40 {offsets = [0, 128], sizes = [2, 32], strides = [1, 1]} : vector<2x384xf32> to vector<2x32xf32>
    %51 = vector.extract_strided_slice %41 {offsets = [0, 128], sizes = [2, 32], strides = [1, 1]} : vector<2x384xf32> to vector<2x32xf32>
    %52 = arith.addf %50, %51 : vector<2x32xf32>
    %53 = arith.negf %52 : vector<2x32xf32>
    %54 = math.exp %53 : vector<2x32xf32>
    %cst_16 = arith.constant 1.000000e+00 : f32
    %55 = vector.broadcast %cst_16 : f32 to vector<2x32xf32>
    %56 = arith.addf %55, %54 : vector<2x32xf32>
    %57 = arith.divf %55, %56 : vector<2x32xf32>
    %58 = vector.extract_strided_slice %40 {offsets = [0, 256], sizes = [2, 32], strides = [1, 1]} : vector<2x384xf32> to vector<2x32xf32>
    %59 = vector.extract_strided_slice %41 {offsets = [0, 256], sizes = [2, 32], strides = [1, 1]} : vector<2x384xf32> to vector<2x32xf32>
    %60 = arith.addf %59, %3 : vector<2x32xf32>
    %61 = arith.mulf %49, %60 : vector<2x32xf32>
    %62 = arith.addf %58, %61 : vector<2x32xf32>
    %63 = math.tanh %62 : vector<2x32xf32>
    %cst_17 = arith.constant 1.000000e+00 : f32
    %64 = vector.broadcast %cst_17 : f32 to vector<2x32xf32>
    %65 = arith.subf %64, %57 : vector<2x32xf32>
    %66 = arith.mulf %65, %63 : vector<2x32xf32>
    %67 = arith.mulf %57, %39 : vector<2x32xf32>
    %68 = arith.addf %66, %67 : vector<2x32xf32>
    %69 = vector.extract_strided_slice %9 {offsets = [4, 0], sizes = [2, 384], strides = [1, 1]} : vector<16x384xf32> to vector<2x384xf32>
    %cst_18 = arith.constant dense<0.000000e+00> : vector<2x384xf32>
    %70 = tpu.matmul %68, %0, %cst_18 {dimension_numbers = #tpu.dot_dimension_numbers<[1], [0], [0], [1], [0, 0, 1, 1], [], []>} : vector<2x32xf32>, vector<32x384xf32>, vector<2x384xf32> -> vector<2x384xf32>
    %71 = vector.extract_strided_slice %69 {offsets = [0, 0], sizes = [2, 32], strides = [1, 1]} : vector<2x384xf32> to vector<2x32xf32>
    %72 = vector.extract_strided_slice %70 {offsets = [0, 0], sizes = [2, 32], strides = [1, 1]} : vector<2x384xf32> to vector<2x32xf32>
    %73 = arith.addf %71, %72 : vector<2x32xf32>
    %74 = arith.negf %73 : vector<2x32xf32>
    %75 = math.exp %74 : vector<2x32xf32>
    %cst_19 = arith.constant 1.000000e+00 : f32
    %76 = vector.broadcast %cst_19 : f32 to vector<2x32xf32>
    %77 = arith.addf %76, %75 : vector<2x32xf32>
    %78 = arith.divf %76, %77 : vector<2x32xf32>
    %79 = vector.extract_strided_slice %69 {offsets = [0, 128], sizes = [2, 32], strides = [1, 1]} : vector<2x384xf32> to vector<2x32xf32>
    %80 = vector.extract_strided_slice %70 {offsets = [0, 128], sizes = [2, 32], strides = [1, 1]} : vector<2x384xf32> to vector<2x32xf32>
    %81 = arith.addf %79, %80 : vector<2x32xf32>
    %82 = arith.negf %81 : vector<2x32xf32>
    %83 = math.exp %82 : vector<2x32xf32>
    %cst_20 = arith.constant 1.000000e+00 : f32
    %84 = vector.broadcast %cst_20 : f32 to vector<2x32xf32>
    %85 = arith.addf %84, %83 : vector<2x32xf32>
    %86 = arith.divf %84, %85 : vector<2x32xf32>
    %87 = vector.extract_strided_slice %69 {offsets = [0, 256], sizes = [2, 32], strides = [1, 1]} : vector<2x384xf32> to vector<2x32xf32>
    %88 = vector.extract_strided_slice %70 {offsets = [0, 256], sizes = [2, 32], strides = [1, 1]} : vector<2x384xf32> to vector<2x32xf32>
    %89 = arith.addf %88, %3 : vector<2x32xf32>
    %90 = arith.mulf %78, %89 : vector<2x32xf32>
    %91 = arith.addf %87, %90 : vector<2x32xf32>
    %92 = math.tanh %91 : vector<2x32xf32>
    %cst_21 = arith.constant 1.000000e+00 : f32
    %93 = vector.broadcast %cst_21 : f32 to vector<2x32xf32>
    %94 = arith.subf %93, %86 : vector<2x32xf32>
    %95 = arith.mulf %94, %92 : vector<2x32xf32>
    %96 = arith.mulf %86, %68 : vector<2x32xf32>
    %97 = arith.addf %95, %96 : vector<2x32xf32>
    %98 = vector.extract_strided_slice %9 {offsets = [6, 0], sizes = [2, 384], strides = [1, 1]} : vector<16x384xf32> to vector<2x384xf32>
    %cst_22 = arith.constant dense<0.000000e+00> : vector<2x384xf32>
    %99 = tpu.matmul %97, %0, %cst_22 {dimension_numbers = #tpu.dot_dimension_numbers<[1], [0], [0], [1], [0, 0, 1, 1], [], []>} : vector<2x32xf32>, vector<32x384xf32>, vector<2x384xf32> -> vector<2x384xf32>
    %100 = vector.extract_strided_slice %98 {offsets = [0, 0], sizes = [2, 32], strides = [1, 1]} : vector<2x384xf32> to vector<2x32xf32>
    %101 = vector.extract_strided_slice %99 {offsets = [0, 0], sizes = [2, 32], strides = [1, 1]} : vector<2x384xf32> to vector<2x32xf32>
    %102 = arith.addf %100, %101 : vector<2x32xf32>
    %103 = arith.negf %102 : vector<2x32xf32>
    %104 = math.exp %103 : vector<2x32xf32>
    %cst_23 = arith.constant 1.000000e+00 : f32
    %105 = vector.broadcast %cst_23 : f32 to vector<2x32xf32>
    %106 = arith.addf %105, %104 : vector<2x32xf32>
    %107 = arith.divf %105, %106 : vector<2x32xf32>
    %108 = vector.extract_strided_slice %98 {offsets = [0, 128], sizes = [2, 32], strides = [1, 1]} : vector<2x384xf32> to vector<2x32xf32>
    %109 = vector.extract_strided_slice %99 {offsets = [0, 128], sizes = [2, 32], strides = [1, 1]} : vector<2x384xf32> to vector<2x32xf32>
    %110 = arith.addf %108, %109 : vector<2x32xf32>
    %111 = arith.negf %110 : vector<2x32xf32>
    %112 = math.exp %111 : vector<2x32xf32>
    %cst_24 = arith.constant 1.000000e+00 : f32
    %113 = vector.broadcast %cst_24 : f32 to vector<2x32xf32>
    %114 = arith.addf %113, %112 : vector<2x32xf32>
    %115 = arith.divf %113, %114 : vector<2x32xf32>
    %116 = vector.extract_strided_slice %98 {offsets = [0, 256], sizes = [2, 32], strides = [1, 1]} : vector<2x384xf32> to vector<2x32xf32>
    %117 = vector.extract_strided_slice %99 {offsets = [0, 256], sizes = [2, 32], strides = [1, 1]} : vector<2x384xf32> to vector<2x32xf32>
    %118 = arith.addf %117, %3 : vector<2x32xf32>
    %119 = arith.mulf %107, %118 : vector<2x32xf32>
    %120 = arith.addf %116, %119 : vector<2x32xf32>
    %121 = math.tanh %120 : vector<2x32xf32>
    %cst_25 = arith.constant 1.000000e+00 : f32
    %122 = vector.broadcast %cst_25 : f32 to vector<2x32xf32>
    %123 = arith.subf %122, %115 : vector<2x32xf32>
    %124 = arith.mulf %123, %121 : vector<2x32xf32>
    %125 = arith.mulf %115, %97 : vector<2x32xf32>
    %126 = arith.addf %124, %125 : vector<2x32xf32>
    %127 = vector.extract_strided_slice %9 {offsets = [8, 0], sizes = [2, 384], strides = [1, 1]} : vector<16x384xf32> to vector<2x384xf32>
    %cst_26 = arith.constant dense<0.000000e+00> : vector<2x384xf32>
    %128 = tpu.matmul %126, %0, %cst_26 {dimension_numbers = #tpu.dot_dimension_numbers<[1], [0], [0], [1], [0, 0, 1, 1], [], []>} : vector<2x32xf32>, vector<32x384xf32>, vector<2x384xf32> -> vector<2x384xf32>
    %129 = vector.extract_strided_slice %127 {offsets = [0, 0], sizes = [2, 32], strides = [1, 1]} : vector<2x384xf32> to vector<2x32xf32>
    %130 = vector.extract_strided_slice %128 {offsets = [0, 0], sizes = [2, 32], strides = [1, 1]} : vector<2x384xf32> to vector<2x32xf32>
    %131 = arith.addf %129, %130 : vector<2x32xf32>
    %132 = arith.negf %131 : vector<2x32xf32>
    %133 = math.exp %132 : vector<2x32xf32>
    %cst_27 = arith.constant 1.000000e+00 : f32
    %134 = vector.broadcast %cst_27 : f32 to vector<2x32xf32>
    %135 = arith.addf %134, %133 : vector<2x32xf32>
    %136 = arith.divf %134, %135 : vector<2x32xf32>
    %137 = vector.extract_strided_slice %127 {offsets = [0, 128], sizes = [2, 32], strides = [1, 1]} : vector<2x384xf32> to vector<2x32xf32>
    %138 = vector.extract_strided_slice %128 {offsets = [0, 128], sizes = [2, 32], strides = [1, 1]} : vector<2x384xf32> to vector<2x32xf32>
    %139 = arith.addf %137, %138 : vector<2x32xf32>
    %140 = arith.negf %139 : vector<2x32xf32>
    %141 = math.exp %140 : vector<2x32xf32>
    %cst_28 = arith.constant 1.000000e+00 : f32
    %142 = vector.broadcast %cst_28 : f32 to vector<2x32xf32>
    %143 = arith.addf %142, %141 : vector<2x32xf32>
    %144 = arith.divf %142, %143 : vector<2x32xf32>
    %145 = vector.extract_strided_slice %127 {offsets = [0, 256], sizes = [2, 32], strides = [1, 1]} : vector<2x384xf32> to vector<2x32xf32>
    %146 = vector.extract_strided_slice %128 {offsets = [0, 256], sizes = [2, 32], strides = [1, 1]} : vector<2x384xf32> to vector<2x32xf32>
    %147 = arith.addf %146, %3 : vector<2x32xf32>
    %148 = arith.mulf %136, %147 : vector<2x32xf32>
    %149 = arith.addf %145, %148 : vector<2x32xf32>
    %150 = math.tanh %149 : vector<2x32xf32>
    %cst_29 = arith.constant 1.000000e+00 : f32
    %151 = vector.broadcast %cst_29 : f32 to vector<2x32xf32>
    %152 = arith.subf %151, %144 : vector<2x32xf32>
    %153 = arith.mulf %152, %150 : vector<2x32xf32>
    %154 = arith.mulf %144, %126 : vector<2x32xf32>
    %155 = arith.addf %153, %154 : vector<2x32xf32>
    %156 = vector.extract_strided_slice %9 {offsets = [10, 0], sizes = [2, 384], strides = [1, 1]} : vector<16x384xf32> to vector<2x384xf32>
    %cst_30 = arith.constant dense<0.000000e+00> : vector<2x384xf32>
    %157 = tpu.matmul %155, %0, %cst_30 {dimension_numbers = #tpu.dot_dimension_numbers<[1], [0], [0], [1], [0, 0, 1, 1], [], []>} : vector<2x32xf32>, vector<32x384xf32>, vector<2x384xf32> -> vector<2x384xf32>
    %158 = vector.extract_strided_slice %156 {offsets = [0, 0], sizes = [2, 32], strides = [1, 1]} : vector<2x384xf32> to vector<2x32xf32>
    %159 = vector.extract_strided_slice %157 {offsets = [0, 0], sizes = [2, 32], strides = [1, 1]} : vector<2x384xf32> to vector<2x32xf32>
    %160 = arith.addf %158, %159 : vector<2x32xf32>
    %161 = arith.negf %160 : vector<2x32xf32>
    %162 = math.exp %161 : vector<2x32xf32>
    %cst_31 = arith.constant 1.000000e+00 : f32
    %163 = vector.broadcast %cst_31 : f32 to vector<2x32xf32>
    %164 = arith.addf %163, %162 : vector<2x32xf32>
    %165 = arith.divf %163, %164 : vector<2x32xf32>
    %166 = vector.extract_strided_slice %156 {offsets = [0, 128], sizes = [2, 32], strides = [1, 1]} : vector<2x384xf32> to vector<2x32xf32>
    %167 = vector.extract_strided_slice %157 {offsets = [0, 128], sizes = [2, 32], strides = [1, 1]} : vector<2x384xf32> to vector<2x32xf32>
    %168 = arith.addf %166, %167 : vector<2x32xf32>
    %169 = arith.negf %168 : vector<2x32xf32>
    %170 = math.exp %169 : vector<2x32xf32>
    %cst_32 = arith.constant 1.000000e+00 : f32
    %171 = vector.broadcast %cst_32 : f32 to vector<2x32xf32>
    %172 = arith.addf %171, %170 : vector<2x32xf32>
    %173 = arith.divf %171, %172 : vector<2x32xf32>
    %174 = vector.extract_strided_slice %156 {offsets = [0, 256], sizes = [2, 32], strides = [1, 1]} : vector<2x384xf32> to vector<2x32xf32>
    %175 = vector.extract_strided_slice %157 {offsets = [0, 256], sizes = [2, 32], strides = [1, 1]} : vector<2x384xf32> to vector<2x32xf32>
    %176 = arith.addf %175, %3 : vector<2x32xf32>
    %177 = arith.mulf %165, %176 : vector<2x32xf32>
    %178 = arith.addf %174, %177 : vector<2x32xf32>
    %179 = math.tanh %178 : vector<2x32xf32>
    %cst_33 = arith.constant 1.000000e+00 : f32
    %180 = vector.broadcast %cst_33 : f32 to vector<2x32xf32>
    %181 = arith.subf %180, %173 : vector<2x32xf32>
    %182 = arith.mulf %181, %179 : vector<2x32xf32>
    %183 = arith.mulf %173, %155 : vector<2x32xf32>
    %184 = arith.addf %182, %183 : vector<2x32xf32>
    %185 = vector.extract_strided_slice %9 {offsets = [12, 0], sizes = [2, 384], strides = [1, 1]} : vector<16x384xf32> to vector<2x384xf32>
    %cst_34 = arith.constant dense<0.000000e+00> : vector<2x384xf32>
    %186 = tpu.matmul %184, %0, %cst_34 {dimension_numbers = #tpu.dot_dimension_numbers<[1], [0], [0], [1], [0, 0, 1, 1], [], []>} : vector<2x32xf32>, vector<32x384xf32>, vector<2x384xf32> -> vector<2x384xf32>
    %187 = vector.extract_strided_slice %185 {offsets = [0, 0], sizes = [2, 32], strides = [1, 1]} : vector<2x384xf32> to vector<2x32xf32>
    %188 = vector.extract_strided_slice %186 {offsets = [0, 0], sizes = [2, 32], strides = [1, 1]} : vector<2x384xf32> to vector<2x32xf32>
    %189 = arith.addf %187, %188 : vector<2x32xf32>
    %190 = arith.negf %189 : vector<2x32xf32>
    %191 = math.exp %190 : vector<2x32xf32>
    %cst_35 = arith.constant 1.000000e+00 : f32
    %192 = vector.broadcast %cst_35 : f32 to vector<2x32xf32>
    %193 = arith.addf %192, %191 : vector<2x32xf32>
    %194 = arith.divf %192, %193 : vector<2x32xf32>
    %195 = vector.extract_strided_slice %185 {offsets = [0, 128], sizes = [2, 32], strides = [1, 1]} : vector<2x384xf32> to vector<2x32xf32>
    %196 = vector.extract_strided_slice %186 {offsets = [0, 128], sizes = [2, 32], strides = [1, 1]} : vector<2x384xf32> to vector<2x32xf32>
    %197 = arith.addf %195, %196 : vector<2x32xf32>
    %198 = arith.negf %197 : vector<2x32xf32>
    %199 = math.exp %198 : vector<2x32xf32>
    %cst_36 = arith.constant 1.000000e+00 : f32
    %200 = vector.broadcast %cst_36 : f32 to vector<2x32xf32>
    %201 = arith.addf %200, %199 : vector<2x32xf32>
    %202 = arith.divf %200, %201 : vector<2x32xf32>
    %203 = vector.extract_strided_slice %185 {offsets = [0, 256], sizes = [2, 32], strides = [1, 1]} : vector<2x384xf32> to vector<2x32xf32>
    %204 = vector.extract_strided_slice %186 {offsets = [0, 256], sizes = [2, 32], strides = [1, 1]} : vector<2x384xf32> to vector<2x32xf32>
    %205 = arith.addf %204, %3 : vector<2x32xf32>
    %206 = arith.mulf %194, %205 : vector<2x32xf32>
    %207 = arith.addf %203, %206 : vector<2x32xf32>
    %208 = math.tanh %207 : vector<2x32xf32>
    %cst_37 = arith.constant 1.000000e+00 : f32
    %209 = vector.broadcast %cst_37 : f32 to vector<2x32xf32>
    %210 = arith.subf %209, %202 : vector<2x32xf32>
    %211 = arith.mulf %210, %208 : vector<2x32xf32>
    %212 = arith.mulf %202, %184 : vector<2x32xf32>
    %213 = arith.addf %211, %212 : vector<2x32xf32>
    %214 = vector.extract_strided_slice %9 {offsets = [14, 0], sizes = [2, 384], strides = [1, 1]} : vector<16x384xf32> to vector<2x384xf32>
    %cst_38 = arith.constant dense<0.000000e+00> : vector<2x384xf32>
    %215 = tpu.matmul %213, %0, %cst_38 {dimension_numbers = #tpu.dot_dimension_numbers<[1], [0], [0], [1], [0, 0, 1, 1], [], []>} : vector<2x32xf32>, vector<32x384xf32>, vector<2x384xf32> -> vector<2x384xf32>
    %216 = vector.extract_strided_slice %214 {offsets = [0, 0], sizes = [2, 32], strides = [1, 1]} : vector<2x384xf32> to vector<2x32xf32>
    %217 = vector.extract_strided_slice %215 {offsets = [0, 0], sizes = [2, 32], strides = [1, 1]} : vector<2x384xf32> to vector<2x32xf32>
    %218 = arith.addf %216, %217 : vector<2x32xf32>
    %219 = arith.negf %218 : vector<2x32xf32>
    %220 = math.exp %219 : vector<2x32xf32>
    %cst_39 = arith.constant 1.000000e+00 : f32
    %221 = vector.broadcast %cst_39 : f32 to vector<2x32xf32>
    %222 = arith.addf %221, %220 : vector<2x32xf32>
    %223 = arith.divf %221, %222 : vector<2x32xf32>
    %224 = vector.extract_strided_slice %214 {offsets = [0, 128], sizes = [2, 32], strides = [1, 1]} : vector<2x384xf32> to vector<2x32xf32>
    %225 = vector.extract_strided_slice %215 {offsets = [0, 128], sizes = [2, 32], strides = [1, 1]} : vector<2x384xf32> to vector<2x32xf32>
    %226 = arith.addf %224, %225 : vector<2x32xf32>
    %227 = arith.negf %226 : vector<2x32xf32>
    %228 = math.exp %227 : vector<2x32xf32>
    %cst_40 = arith.constant 1.000000e+00 : f32
    %229 = vector.broadcast %cst_40 : f32 to vector<2x32xf32>
    %230 = arith.addf %229, %228 : vector<2x32xf32>
    %231 = arith.divf %229, %230 : vector<2x32xf32>
    %232 = vector.extract_strided_slice %214 {offsets = [0, 256], sizes = [2, 32], strides = [1, 1]} : vector<2x384xf32> to vector<2x32xf32>
    %233 = vector.extract_strided_slice %215 {offsets = [0, 256], sizes = [2, 32], strides = [1, 1]} : vector<2x384xf32> to vector<2x32xf32>
    %234 = arith.addf %233, %3 : vector<2x32xf32>
    %235 = arith.mulf %223, %234 : vector<2x32xf32>
    %236 = arith.addf %232, %235 : vector<2x32xf32>
    %237 = math.tanh %236 : vector<2x32xf32>
    %cst_41 = arith.constant 1.000000e+00 : f32
    %238 = vector.broadcast %cst_41 : f32 to vector<2x32xf32>
    %239 = arith.subf %238, %231 : vector<2x32xf32>
    %240 = arith.mulf %239, %237 : vector<2x32xf32>
    %241 = arith.mulf %231, %213 : vector<2x32xf32>
    %242 = arith.addf %240, %241 : vector<2x32xf32>
    %243 = tpu.concatenate %39, %68, %97, %126, %155, %184, %213, %242 in 1 : vector<2x32xf32>, vector<2x32xf32>, vector<2x32xf32>, vector<2x32xf32>, vector<2x32xf32>, vector<2x32xf32>, vector<2x32xf32>, vector<2x32xf32> -> vector<2x256xf32>
    %c0_42 = arith.constant 0 : index
    %c0_43 = arith.constant 0 : index
    %244 = vector.load %arg1[%c0_42, %c0_43] : memref<2x256xf32, #tpu.memory_space<vmem>>, vector<2x256xf32>
    %245 = arith.addf %243, %244 : vector<2x256xf32>
    %246 = math.tanh %245 : vector<2x256xf32>
    %c0_44 = arith.constant 0 : index
    %c0_45 = arith.constant 0 : index
    %247 = vector.load %arg6[%c0_44, %c0_45] : memref<2x256xf32, #tpu.memory_space<vmem>>, vector<2x256xf32>
    tpu.vector_store %arg6[%c0_44, %c0_45], %246 {strides = array<i32>} : memref<2x256xf32, #tpu.memory_space<vmem>>, vector<2x256xf32>,
    return
  }
}

</mosaic_0001>

<bundles_post_ra>
// kernel: func_forward.1
= control target key start
LH: loop header
LB: loop body
LE: loop exit
PB: predicated region body
PF: predicated region fallthrough
CT: control target
= control target key end

     0   :  { %v2092_v3 = vmov 0.0   ;;  %vm73_vm0 = vcmask 261120   ;;  %v2093_v36 = vmov 0.0|0.0   ;;  %vm2094_vm1 = vmmov 0   ;;  %s2096_s25 = smov 64   ;;  %s2097_s26 = smov 96   ;;  %s2417_s2 = inlined_call_operand.vmem [shape: f32[32,384], index: 2, kind: input, shape index: {}]   ;;  %s2418_s0 = inlined_call_operand.vmem [shape: f32[16,32], index: 0, kind: input, shape index: {}]   ;;  %s2419_s3 = inlined_call_operand.vmem [shape: f32[32,384], index: 3, kind: input, shape index: {}]   ;;  %s2420_s4 = inlined_call_operand.vmem [shape: f32[1,384], index: 4, kind: input, shape index: {}]   ;;  %s2421_s5 = inlined_call_operand.vmem [shape: f32[1,32], index: 5, kind: input, shape index: {}]   ;;  %s2422_s1 = inlined_call_operand.vmem [shape: f32[2,256], index: 1, kind: input, shape index: {}]   ;;  %s2423_s6 = inlined_call_operand.vmem [shape: f32[2,256], index: 6, kind: output, shape index: {}]  }
   0x1   :  { %v45_v0 = vld [vmem:[%s2417_s2 + $0x8] sm:$0xff]  ;;  %v48_v1 = vld [vmem:[%s2417_s2 + $0x20] sm:$0xff]  ;;  %144 = vmatprep.mubr.f32.mxu0 %v2092_v3  ;;  %v47_v5 = vld [vmem:[%s2417_s2 + $0x18] sm:$0xff]  ;;  %v58_v40 = vlaneseq  ;;  %vm1653_vm2 = vcmask 523264   ;;  %vm1655_vm3 = vcmask 785408  }
   0x2   :  { %v44_v2 = vld [vmem:[%s2417_s2] sm:$0xff]  ;;  %v1874_v4 = vpack.c.bf16 %v48_v1, %v45_v0  ;;  %v51_v6 = vld [vmem:[%s2417_s2 + $0x38] sm:$0xff]  ;;  %v54_v7 = vld [vmem:[%s2417_s2 + $0x50] sm:$0xff] }
   0x3   :  { %v1876_v8 = vpack.c.bf16 %v47_v5, %v44_v2  ;;  %v1878_v9 = vpack.c.bf16 %v54_v7, %v51_v6  ;;  %v50_v10 = vld [vmem:[%s2417_s2 + $0x30] sm:$0xff]  ;;  %v53_v11 = vld [vmem:[%s2417_s2 + $0x48] sm:$0xff]  ;;  %v42_v12 = vld [vmem:[%s2418_s0] sm:$0xff]  ;;  %v59_v41 = vshrl.u32 %v58_v40, 7 }
   0x4   :  { %1875 = vmatprep.subr.bf16.mxu0 %v1874_v4  ;;  %v24_v13 = vld [vmem:[%s2419_s3 + $0x8] sm:$0xff]  ;;  %v27_v14 = vld [vmem:[%s2419_s3 + $0x20] sm:$0xff]  ;;  %1783 = vmatprep.mubr.msk.f32.mxu1 %vm73_vm0, %v42_v12  ;;  %v1880_v15 = vpack.c.bf16 %v53_v11, %v50_v10  ;;  %v26_v18 = vld [vmem:[%s2419_s3 + $0x18] sm:$0xff] }
   0x5   :  { %1877 = vmatpush1.bf16.msra.mxu0 %v1876_v8  ;;  %v23_v16 = vld [vmem:[%s2419_s3] sm:$0xff]  ;;  %v2171_v17 = vpack.c.bf16 %v27_v14, %v24_v13  ;;  %v30_v19 = vld [vmem:[%s2419_s3 + $0x38] sm:$0xff]  ;;  %v33_v20 = vld [vmem:[%s2419_s3 + $0x50] sm:$0xff]  ;;  %v60_v42 = vsub.s32 0, %v59_v41  ;;  %v68_v43 = vsub.s32 2, %v59_v41  ;;  %v64_v46 = vsub.s32 1, %v59_v41 }
   0x6   :  { %1879 = vmatprep.subr.bf16.mxu0 %v1878_v9  ;;  %v46_v21 = vld [vmem:[%s2417_s2 + $0x10] sm:$0xff]  ;;  %v49_v22 = vld [vmem:[%s2417_s2 + $0x28] sm:$0xff]  ;;  %v52_v23 = vld [vmem:[%s2417_s2 + $0x40] sm:$0xff]  ;;  %v2194_v26 = vpack.c.bf16 %v26_v18, %v23_v16  ;;  %v2197_v28 = vpack.c.bf16 %v33_v20, %v30_v19 }
   0x7   :  { %v1882_v24 = vpack.c.bf16 %v49_v22, %v46_v21  ;;  %v55_v25 = vld [vmem:[%s2417_s2 + $0x58] sm:$0xff]  ;;  %v29_v29 = vld [vmem:[%s2419_s3 + $0x30] sm:$0xff]  ;;  %v32_v30 = vld [vmem:[%s2419_s3 + $0x48] sm:$0xff] }
   0x8   :  { %v1886_v27 = vpack.c.bf16 %v55_v25, %v52_v23  ;;  %v25_v31 = vld [vmem:[%s2419_s3 + $0x10] sm:$0xff]  ;;  %v28_v32 = vld [vmem:[%s2419_s3 + $0x28] sm:$0xff]  ;;  %v2217_v34 = vpack.c.bf16 %v32_v30, %v29_v29  ;;  %v31_v37 = vld [vmem:[%s2419_s3 + $0x40] sm:$0xff] }
   0x9   :  { %1881 = vmatpush1.bf16.msra.mxu0 %v1880_v15  ;;  %1883 = vmatprep.subr.bf16.mxu1 %v1882_v24  ;;  %v43_v33 = vld [vmem:[%s2418_s0 + $0x8] sm:$0xff]  ;;  %v2220_v35 = vpack.c.bf16 %v28_v32, %v25_v31  ;;  %v34_v38 = vld [vmem:[%s2419_s3 + $0x58] sm:$0xff]  ;;  %v56_v44 = vld [vmem:[%s2420_s4] sm:$0x7] }
   0xa   :  { %1891 = vmatprep.subr.bf16.mxu0 %v2171_v17  ;;  %1885 = vmatpush3.bf16.msra.mxu1 %v1882_v24  ;;  %v2235_v39 = vpack.c.bf16 %v34_v38, %v31_v37  ;;  %v61_v48 = vrot.slane %v56_v44, %v60_v42  ;;  %v69_v49 = vrot.slane %v56_v44, %v68_v43  ;;  %v2273_v8 = vld [vmem:[%s2421_s5] ss:$0 sm:$0xff]  ;;  %s2095_s5 = smov 32  }
   0xb   :  { %1887 = vmatprep.subr.bf16.mxu1 %v1886_v27  ;;  %v65_v50 = vrot.slane %v56_v44, %v64_v46 }
   0xc   :  { %1693 = vmatmul.mubr.msk.f32.vlgmr.msra.gmra.mrb[0].mxu0 %vm73_vm0, %v42_v12 }
   0xd   :  { %1893 = vmatpush1.bf16.msra.mxu0 %v2194_v26  ;;  %150 = vmatprep.mubr.f32.mxu0 %v2092_v3 }
   0xe   :  { %1895 = vmatprep.subr.bf16.mxu0 %v2197_v28  ;;  %1889 = vmatpush3.bf16.msra.mxu1 %v1886_v27 }
   0xf   :  { %1898 = vmatprep.subr.bf16.mxu1 %v2093_v36 }
  0x10   :  { %1694 = vmatmul.mubr.msk.f32.gmra.mrb[2].mxu0 %vm73_vm0, %v43_v33 }
  0x11   :  { %1897 = vmatpush1.bf16.msra.mxu0 %v2217_v34  ;;  %299 = vmatprep.mubr.f32.mxu0 %v2092_v3 }
  0x12   :  { %1784 = vmatmul.mubr.msk.f32.vlgmr.msra.gmra.mrb[0].mxu1 %vm73_vm0, %v43_v33  ;;  %1905 = vmatprep.subr.bf16.mxu0 %v2171_v17 }
  0x13   :  { %1900 = vmatpush3.bf16.msra.mxu1 %v2220_v35  ;;  %1794 = vmatprep.mubr.msk.f32.mxu1 %vm2094_vm1, %v2092_v3 }
  0x14   :  { %300 = vmatmul.mubr.f32.vlgmr.msra.gmra.mrb[4].mxu0 %v2092_v3  ;;  %1901 = vmatprep.subr.bf16.mxu1 %v2093_v36 }
  0x15   :  { %1907 = vmatpush1.bf16.msra.mxu0 %v2194_v26  ;;  %465 = vmatprep.mubr.f32.mxu0 %v2092_v3 }
  0x16   :  { %1909 = vmatprep.subr.bf16.mxu0 %v2197_v28 }
  0x17   :  { %1903 = vmatpush3.bf16.msra.mxu1 %v2235_v39 }
  0x18   :  { %1912 = vmatprep.subr.bf16.mxu1 %v2093_v36 }
  0x19   :  { %1911 = vmatpush1.bf16.msra.mxu0 %v2217_v34 }
  0x1a   :  { %1795 = vmatmul.mubr.f32.vlgmr.msra.gmra.mrb[2].mxu1 %v2092_v3  ;;  %1919 = vmatprep.subr.bf16.mxu0 %v2171_v17 }
  0x1b   :  { %1914 = vmatpush3.bf16.msra.mxu1 %v2220_v35  ;;  %1805 = vmatprep.mubr.msk.f32.mxu1 %vm2094_vm1, %v2092_v3 }
  0x1c   :  { %1915 = vmatprep.subr.bf16.mxu1 %v2093_v36 }
  0x1f   :  { %1917 = vmatpush3.bf16.msra.mxu1 %v2235_v39 }
  0x20   :  { %1926 = vmatprep.subr.bf16.mxu1 %v2093_v36 }
  0xdf   :  { %v146_v45 = vpop.f32.mrb[0].mxu0 }
  0xe0   :  { %v148_v47 = vpop.f32.mrb[1].mxu0  ;;  %v2262_v56 = vadd.f32 %v146_v45, %v61_v48 }
  0xe1   :  { %v2267_v62 = vadd.f32 %v148_v47, %v65_v50 }
  0xe3   :  { %v152_v51 = vpop.f32.mrb[2].mxu0 }
  0xe4   :  { %v2258_v52 = vadd.f32 %v152_v51, %v61_v48  ;;  %v154_v53 = vpop.f32.mrb[3].mxu0 }
  0xe5   :  { %v2260_v54 = vadd.f32 %v154_v53, %v65_v50  ;;  %v1785_v55 = vpop.f32.mrb[0].mxu1 }
  0xe6   :  { %v2264_v57 = vadd.f32 %v1785_v55, %v69_v49  ;;  %v223_v58 = vpop.f32.mrb[1].mxu1 }
  0xe7   :  { %v301_v59 = vpop.f32.mrb[4].mxu0  ;;  %v2276_v12 = vadd.f32 %v223_v58, %v69_v49 }
  0xe8   :  { %v376_v60 = vadd.f32 %v301_v59, %v2262_v56  ;;  %v303_v61 = vpop.f32.mrb[5].mxu0 }
  0xe9   :  { %v383_v0 = vadd.f32 %v303_v61, %v2267_v62 }
  0xea   :  { %v1697_v63 = vmul.f32 -1.442695, %v376_v60 }
  0xeb   :  { %v1698_v4 = vmul.f32 -1.442695, %v383_v0 }
  0xec   :  { %2008 = vpow2.f32 %v1697_v63 }
  0xed   :  { %v372_v1 = vpop.f32.mrb[2].mxu1  ;;  %2010 = vpow2.f32 %v1698_v4 }
  0xee   :  { %v1796_v2 = vpop.f32.mrb[3].mxu1  ;;  %v390_v10 = vadd.f32 %v2273_v8, %v372_v1 }
  0xf6   :  { %v2009_v5 = vpop.eup %2008 }
  0xf7   :  { %v380_v6 = vadd.f32 1.0, %v2009_v5  ;;  %v2011_v7 = vpop.eup %2010 }
  0xf8   :  { %v387_v9 = vadd.f32 1.0, %v2011_v7 }
  0xf9   :  { %2012 = vrcp.f32 %v380_v6 }
  0xfa   :  { %2014 = vrcp.f32 %v387_v9 }
 0x103   :  { %v2013_v11 = vpop.eup %2012 }
 0x104   :  { %v391_v13 = vmul.f32 %v2013_v11, %v390_v10  ;;  %v2015_v15 = vpop.eup %2014 }
 0x105   :  { %v394_v16 = vsub.f32 1.0, %v2015_v15  ;;  %v396_v20 = vmul.f32 0.0, %v2015_v15 }
 0x106   :  { %v392_v14 = vadd.f32 %v391_v13, %v2276_v12 }
 0x108   :  { %2016 = vtanh.f32 %v392_v14 }
 0x112   :  { %v2017_v18 = vpop.eup %2016 }
 0x113   :  { %v395_v19 = vmul.f32 %v2017_v18, %v394_v16 }
 0x115   :  { %v2279_v21 = vadd.f32 %v396_v20, %v395_v19 }
 0x117   :  { %1699 = vmatmul.mubr.msk.f32.vlgmr.msra.gmra.mrb[6].mxu0 %vm73_vm0, %v2279_v21  ;;  %1806 = vmatmul.mubr.msk.f32.vlgmr.msra.gmra.mrb[4].mxu1 %vm73_vm0, %v2279_v21  ;;  %v571_v49 = vrot.slane %v2279_v21, 6 }
 0x118   :  { %1921 = vmatpush1.bf16.msra.mxu0 %v2194_v26  ;;  %1928 = vmatpush3.bf16.msra.mxu1 %v2220_v35 }
 0x119   :  { %1923 = vmatprep.subr.bf16.mxu0 %v2197_v28  ;;  %1929 = vmatprep.subr.bf16.mxu1 %v2093_v36 }
 0x11a   :  { %643 = vmatprep.mubr.f32.mxu0 %v2092_v3  ;;  %1816 = vmatprep.mubr.msk.f32.mxu1 %vm2094_vm1, %v2092_v3 }
 0x11c   :  { %1925 = vmatpush1.bf16.msra.mxu0 %v2217_v34  ;;  %1931 = vmatpush3.bf16.msra.mxu1 %v2235_v39 }
 0x11d   :  { %1933 = vmatprep.subr.bf16.mxu0 %v2171_v17  ;;  %1940 = vmatprep.subr.bf16.mxu1 %v2093_v36 }
 0x1ea   :  { %v467_v22 = vpop.f32.mrb[6].mxu0  ;;  %v538_v23 = vpop.f32.mrb[4].mxu1 }
 0x1eb   :  { %v543_v24 = vrot.slane %v467_v22, 6  ;;  %v469_v25 = vpop.f32.mrb[7].mxu0  ;;  %v1807_v27 = vpop.f32.mrb[5].mxu1  ;;  %v562_v41 = vadd.f32 %v2273_v8, %v538_v23 }
 0x1ec   :  { %v553_v29 = vrot.slane %v469_v25, 6 }
 0x1ed   :  { %v545_v30 = vadd.f32 %v543_v24, %v2262_v56  ;;  %v564_v43 = vrot.slane %v562_v41, 6 }
 0x1ee   :  { %v555_v32 = vadd.f32 %v553_v29, %v2267_v62 }
 0x1ef   :  { %v1701_v31 = vmul.f32 -1.442695, %v545_v30 }
 0x1f0   :  { %v1702_v33 = vmul.f32 -1.442695, %v555_v32 }
 0x1f1   :  { %2018 = vpow2.f32 %v1701_v31 }
 0x1f2   :  { %2020 = vpow2.f32 %v1702_v33 }
 0x1fb   :  { %v2019_v37 = vpop.eup %2018 }
 0x1fc   :  { %v549_v38 = vadd.f32 1.0, %v2019_v37  ;;  %v2021_v40 = vpop.eup %2020 }
 0x1fd   :  { %v559_v42 = vadd.f32 1.0, %v2021_v40 }
 0x1fe   :  { %2022 = vrcp.f32 %v549_v38 }
 0x1ff   :  { %2024 = vrcp.f32 %v559_v42 }
 0x208   :  { %v2023_v44 = vpop.eup %2022 }
 0x209   :  { %v566_v45 = vmul.f32 %v2023_v44, %v564_v43  ;;  %v2025_v47 = vpop.eup %2024 }
 0x20a   :  { %v569_v48 = vsub.f32 1.0, %v2025_v47  ;;  %v573_v53 = vmul.f32 %v2025_v47, %v571_v49 }
 0x20b   :  { %v567_v46 = vadd.f32 %v566_v45, %v2276_v12 }
 0x20d   :  { %2026 = vtanh.f32 %v567_v46 }
 0x217   :  { %v2027_v50 = vpop.eup %2026 }
 0x218   :  { %v570_v51 = vmul.f32 %v2027_v50, %v569_v48 }
 0x21a   :  { %v574_v55 = vadd.f32 %v573_v53, %v570_v51 }
 0x21c   :  { %v576_v58 = vrot.slane %v574_v55, 2  ;;  %v749_v16 = vrot.slane %v574_v55, 6 }
 0x21e   :  { %1632 = vrot.lane.b32.xlu0 %v576_v58, %s2095_s5  ;;  %1703 = vmatmul.mubr.msk.f32.vlgmr.msra.gmra.mrb[8].mxu0 %vm73_vm0, %v576_v58 }
 0x21f   :  { %1817 = vmatmul.mubr.msk.f32.vlgmr.msra.gmra.mrb[6].mxu1 %vm73_vm0, %v576_v58  ;;  %1935 = vmatpush1.bf16.msra.mxu0 %v2194_v26 }
 0x220   :  { %1942 = vmatpush3.bf16.msra.mxu1 %v2220_v35  ;;  %1937 = vmatprep.subr.bf16.mxu0 %v2197_v28 }
 0x221   :  { %1943 = vmatprep.subr.bf16.mxu1 %v2093_v36  ;;  %821 = vmatprep.mubr.f32.mxu0 %v2092_v3 }
 0x222   :  { %1827 = vmatprep.mubr.msk.f32.mxu1 %vm2094_vm1, %v2092_v3 }
 0x223   :  { %1939 = vmatpush1.bf16.msra.mxu0 %v2217_v34 }
 0x224   :  { %1945 = vmatpush3.bf16.msra.mxu1 %v2235_v39  ;;  %1947 = vmatprep.subr.bf16.mxu0 %v2171_v17 }
 0x225   :  { %1954 = vmatprep.subr.bf16.mxu1 %v2093_v36 }
 0x2f1   :  { %v645_v59 = vpop.f32.mrb[8].mxu0 }
 0x2f2   :  { %v721_v60 = vrot.slane %v645_v59, 4  ;;  %v716_v61 = vpop.f32.mrb[6].mxu1  ;;  %v647_v63 = vpop.f32.mrb[9].mxu0 }
 0x2f3   :  { %v731_v0 = vrot.slane %v647_v63, 4  ;;  %v1818_v1 = vpop.f32.mrb[7].mxu1  ;;  %v740_v13 = vadd.f32 %v2273_v8, %v716_v61 }
 0x2f4   :  { %v723_v2 = vadd.f32 %v721_v60, %v2262_v56 }
 0x2f5   :  { %v733_v4 = vadd.f32 %v731_v0, %v2267_v62  ;;  %v742_v14 = vrot.slane %v740_v13, 4 }
 0x2f6   :  { %v1705_v5 = vmul.f32 -1.442695, %v723_v2 }
 0x2f7   :  { %v1706_v6 = vmul.f32 -1.442695, %v733_v4 }
 0x2f8   :  { %2028 = vpow2.f32 %v1705_v5 }
 0x2f9   :  { %2030 = vpow2.f32 %v1706_v6 }
 0x302   :  { %v2029_v7 = vpop.eup %2028 }
 0x303   :  { %v2031_v9 = vpop.eup %2030  ;;  %v727_v10 = vadd.f32 1.0, %v2029_v7 }
 0x304   :  { %v737_v11 = vadd.f32 1.0, %v2031_v9 }
 0x305   :  { %2032 = vrcp.f32 %v727_v10 }
 0x306   :  { %2034 = vrcp.f32 %v737_v11 }
 0x30f   :  { %v2033_v15 = vpop.eup %2032 }
 0x310   :  { %v2035_v18 = vpop.eup %2034  ;;  %v744_v19 = vmul.f32 %v2033_v15, %v742_v14 }
 0x311   :  { %v751_v20 = vmul.f32 %v2035_v18, %v749_v16  ;;  %v747_v23 = vsub.f32 1.0, %v2035_v18 }
 0x312   :  { %v745_v22 = vadd.f32 %v744_v19, %v2276_v12 }
 0x314   :  { %2036 = vtanh.f32 %v745_v22 }
 0x31e   :  { %v2037_v24 = vpop.eup %2036 }
 0x31f   :  { %v748_v25 = vmul.f32 %v2037_v24, %v747_v23 }
 0x321   :  { %v752_v27 = vadd.f32 %v751_v20, %v748_v25 }
 0x323   :  { %v754_v29 = vrot.slane %v752_v27, 4  ;;  %v927_v51 = vrot.slane %v752_v27, 6 }
 0x325   :  { %1635 = vrot.lane.b32.xlu1 %v754_v29, %s2096_s25  ;;  %1707 = vmatmul.mubr.msk.f32.vlgmr.msra.gmra.mrb[10].mxu0 %vm73_vm0, %v754_v29 }
 0x326   :  { %1828 = vmatmul.mubr.msk.f32.vlgmr.msra.gmra.mrb[8].mxu1 %vm73_vm0, %v754_v29  ;;  %1949 = vmatpush1.bf16.msra.mxu0 %v2194_v26 }
 0x327   :  { %1956 = vmatpush3.bf16.msra.mxu1 %v2220_v35  ;;  %1951 = vmatprep.subr.bf16.mxu0 %v2197_v28 }
 0x328   :  { %1957 = vmatprep.subr.bf16.mxu1 %v2093_v36  ;;  %999 = vmatprep.mubr.f32.mxu0 %v2092_v3 }
 0x329   :  { %1838 = vmatprep.mubr.msk.f32.mxu1 %vm2094_vm1, %v2092_v3 }
 0x32a   :  { %1953 = vmatpush1.bf16.msra.mxu0 %v2217_v34 }
 0x32b   :  { %1959 = vmatpush3.bf16.msra.mxu1 %v2235_v39  ;;  %1961 = vmatprep.subr.bf16.mxu0 %v2171_v17 }
 0x32c   :  { %1968 = vmatprep.subr.bf16.mxu1 %v2093_v36 }
 0x3f8   :  { %v823_v30 = vpop.f32.mrb[10].mxu0 }
 0x3f9   :  { %v899_v31 = vrot.slane %v823_v30, 2  ;;  %v894_v32 = vpop.f32.mrb[8].mxu1  ;;  %v825_v33 = vpop.f32.mrb[11].mxu0 }
 0x3fa   :  { %v909_v37 = vrot.slane %v825_v33, 2  ;;  %v1829_v38 = vpop.f32.mrb[9].mxu1  ;;  %v918_v48 = vadd.f32 %v2273_v8, %v894_v32 }
 0x3fb   :  { %v901_v40 = vadd.f32 %v899_v31, %v2262_v56 }
 0x3fc   :  { %v911_v41 = vadd.f32 %v909_v37, %v2267_v62  ;;  %v920_v49 = vrot.slane %v918_v48, 2 }
 0x3fd   :  { %v1709_v42 = vmul.f32 -1.442695, %v901_v40 }
 0x3fe   :  { %v1710_v43 = vmul.f32 -1.442695, %v911_v41 }
 0x3ff   :  { %2038 = vpow2.f32 %v1709_v42 }
 0x400   :  { %2040 = vpow2.f32 %v1710_v43 }
 0x409   :  { %v2039_v44 = vpop.eup %2038 }
 0x40a   :  { %v2041_v45 = vpop.eup %2040  ;;  %v905_v46 = vadd.f32 1.0, %v2039_v44 }
 0x40b   :  { %v915_v47 = vadd.f32 1.0, %v2041_v45 }
 0x40c   :  { %2042 = vrcp.f32 %v905_v46 }
 0x40d   :  { %2044 = vrcp.f32 %v915_v47 }
 0x416   :  { %v2043_v50 = vpop.eup %2042 }
 0x417   :  { %v2045_v53 = vpop.eup %2044  ;;  %v922_v55 = vmul.f32 %v2043_v50, %v920_v49 }
 0x418   :  { %v929_v56 = vmul.f32 %v2045_v53, %v927_v51  ;;  %v925_v58 = vsub.f32 1.0, %v2045_v53 }
 0x419   :  { %v923_v62 = vadd.f32 %v922_v55, %v2276_v12 }
 0x41b   :  { %2046 = vtanh.f32 %v923_v62 }
 0x425   :  { %v2047_v59 = vpop.eup %2046 }
 0x426   :  { %v926_v60 = vmul.f32 %v2047_v59, %v925_v58 }
 0x428   :  { %v930_v61 = vadd.f32 %v929_v56, %v926_v60 }
 0x42a   :  { %v2337_v63 = vrot.slane %v930_v61, 6 }
 0x42c   :  { %1711 = vmatmul.mubr.msk.f32.vlgmr.msra.gmra.mrb[12].mxu0 %vm73_vm0, %v2337_v63  ;;  %1839 = vmatmul.mubr.msk.f32.vlgmr.msra.gmra.mrb[10].mxu1 %vm73_vm0, %v2337_v63 }
 0x42d   :  { %1963 = vmatpush1.bf16.msra.mxu0 %v2194_v26  ;;  %1970 = vmatpush3.bf16.msra.mxu1 %v2220_v35 }
 0x42e   :  { %1965 = vmatprep.subr.bf16.mxu0 %v2197_v28  ;;  %1971 = vmatprep.subr.bf16.mxu1 %v2093_v36 }
 0x42f   :  { %1166 = vmatprep.mubr.f32.mxu0 %v2092_v3  ;;  %1849 = vmatprep.mubr.msk.f32.mxu1 %vm2094_vm1, %v2092_v3 }
 0x431   :  { %1967 = vmatpush1.bf16.msra.mxu0 %v2217_v34  ;;  %1973 = vmatpush3.bf16.msra.mxu1 %v2235_v39 }
 0x432   :  { %1975 = vmatprep.subr.bf16.mxu0 %v2171_v17  ;;  %1982 = vmatprep.subr.bf16.mxu1 %v2093_v36 }
 0x4ff   :  { %v1001_v12 = vpop.f32.mrb[12].mxu0  ;;  %v1072_v0 = vpop.f32.mrb[10].mxu1 }
 0x500   :  { %v1076_v1 = vadd.f32 %v1001_v12, %v2258_v52  ;;  %v1003_v2 = vpop.f32.mrb[13].mxu0  ;;  %v1840_v4 = vpop.f32.mrb[11].mxu1  ;;  %v1090_v14 = vadd.f32 %v2273_v8, %v1072_v0 }
 0x501   :  { %v1083_v6 = vadd.f32 %v1003_v2, %v2260_v54 }
 0x502   :  { %v1713_v5 = vmul.f32 -1.442695, %v1076_v1 }
 0x503   :  { %v1714_v7 = vmul.f32 -1.442695, %v1083_v6 }
 0x504   :  { %2048 = vpow2.f32 %v1713_v5 }
 0x505   :  { %2050 = vpow2.f32 %v1714_v7 }
 0x50e   :  { %v2049_v9 = vpop.eup %2048 }
 0x50f   :  { %v1080_v10 = vadd.f32 1.0, %v2049_v9  ;;  %v2051_v11 = vpop.eup %2050 }
 0x510   :  { %v1087_v13 = vadd.f32 1.0, %v2051_v11 }
 0x511   :  { %2052 = vrcp.f32 %v1080_v10 }
 0x512   :  { %2054 = vrcp.f32 %v1087_v13 }
 0x51b   :  { %v2053_v15 = vpop.eup %2052 }
 0x51c   :  { %v1091_v16 = vmul.f32 %v2053_v15, %v1090_v14  ;;  %v2055_v19 = vpop.eup %2054 }
 0x51d   :  { %v1094_v20 = vsub.f32 1.0, %v2055_v19  ;;  %v1097_v24 = vmul.f32 %v2055_v19, %v2337_v63 }
 0x51e   :  { %v1092_v18 = vadd.f32 %v1091_v16, %v2264_v57 }
 0x520   :  { %2056 = vtanh.f32 %v1092_v18 }
 0x52a   :  { %v2057_v22 = vpop.eup %2056 }
 0x52b   :  { %v1095_v23 = vmul.f32 %v2057_v22, %v1094_v20 }
 0x52d   :  { %v2359_v25 = vadd.f32 %v1097_v24, %v1095_v23 }
 0x52f   :  { %1715 = vmatmul.mubr.msk.f32.vlgmr.msra.gmra.mrb[14].mxu0 %vm73_vm0, %v2359_v25  ;;  %1850 = vmatmul.mubr.msk.f32.vlgmr.msra.gmra.mrb[12].mxu1 %vm73_vm0, %v2359_v25  ;;  %v1272_v53 = vrot.slane %v2359_v25, 6 }
 0x530   :  { %1977 = vmatpush1.bf16.msra.mxu0 %v2194_v26  ;;  %1984 = vmatpush3.bf16.msra.mxu1 %v2220_v35 }
 0x531   :  { %1979 = vmatprep.subr.bf16.mxu0 %v2197_v28  ;;  %1985 = vmatprep.subr.bf16.mxu1 %v2093_v36 }
 0x532   :  { %1344 = vmatprep.mubr.f32.mxu0 %v2092_v3  ;;  %1860 = vmatprep.mubr.msk.f32.mxu1 %vm2094_vm1, %v2092_v3 }
 0x534   :  { %1981 = vmatpush1.bf16.msra.mxu0 %v2217_v34  ;;  %1987 = vmatpush3.bf16.msra.mxu1 %v2235_v39 }
 0x535   :  { %1989 = vmatprep.subr.bf16.mxu0 %v2171_v17  ;;  %1996 = vmatprep.subr.bf16.mxu1 %v2093_v36 }
 0x602   :  { %v1168_v27 = vpop.f32.mrb[14].mxu0  ;;  %v1239_v29 = vpop.f32.mrb[12].mxu1 }
 0x603   :  { %v1244_v30 = vrot.slane %v1168_v27, 6  ;;  %v1170_v31 = vpop.f32.mrb[15].mxu0  ;;  %v1851_v32 = vpop.f32.mrb[13].mxu1  ;;  %v1263_v44 = vadd.f32 %v2273_v8, %v1239_v29 }
 0x604   :  { %v1254_v33 = vrot.slane %v1170_v31, 6 }
 0x605   :  { %v1246_v37 = vadd.f32 %v1244_v30, %v2258_v52  ;;  %v1265_v46 = vrot.slane %v1263_v44, 6 }
 0x606   :  { %v1256_v40 = vadd.f32 %v1254_v33, %v2260_v54 }
 0x607   :  { %v1717_v38 = vmul.f32 -1.442695, %v1246_v37 }
 0x608   :  { %v1718_v41 = vmul.f32 -1.442695, %v1256_v40 }
 0x609   :  { %2058 = vpow2.f32 %v1717_v38 }
 0x60a   :  { %2060 = vpow2.f32 %v1718_v41 }
 0x613   :  { %v2059_v42 = vpop.eup %2058 }
 0x614   :  { %v1250_v43 = vadd.f32 1.0, %v2059_v42  ;;  %v2061_v17 = vpop.eup %2060 }
 0x615   :  { %v1260_v45 = vadd.f32 1.0, %v2061_v17 }
 0x616   :  { %2062 = vrcp.f32 %v1250_v43 }
 0x617   :  { %2064 = vrcp.f32 %v1260_v45 }
 0x620   :  { %v2063_v47 = vpop.eup %2062 }
 0x621   :  { %v1267_v48 = vmul.f32 %v2063_v47, %v1265_v46  ;;  %v2065_v50 = vpop.eup %2064 }
 0x622   :  { %v1270_v51 = vsub.f32 1.0, %v2065_v50  ;;  %v1274_v62 = vmul.f32 %v2065_v50, %v1272_v53  ;;  %v1633_v53 = vpop.permute.xlu0 %1632 }
 0x623   :  { %v1268_v49 = vadd.f32 %v1267_v48, %v2264_v57 }
 0x625   :  { %2066 = vtanh.f32 %v1268_v49 }
 0x62f   :  { %v2067_v55 = vpop.eup %2066 }
 0x630   :  { %v1271_v56 = vmul.f32 %v2067_v55, %v1270_v51 }
 0x632   :  { %v1275_v58 = vadd.f32 %v1274_v62, %v1271_v56  ;;  %v1652_v62 = vsel %vm73_vm0, %v2279_v21, %v1633_v53 }
 0x634   :  { %v1277_v59 = vrot.slane %v1275_v58, 2  ;;  %v1450_v7 = vrot.slane %v1275_v58, 6 }
 0x636   :  { %1641 = vrot.lane.b32.xlu0 %v1277_v59, %s2095_s5  ;;  %1719 = vmatmul.mubr.msk.f32.vlgmr.msra.gmra.mrb[16].mxu0 %vm73_vm0, %v1277_v59 }
 0x637   :  { %1861 = vmatmul.mubr.msk.f32.vlgmr.msra.gmra.mrb[14].mxu1 %vm73_vm0, %v1277_v59  ;;  %1991 = vmatpush1.bf16.msra.mxu0 %v2194_v26 }
 0x638   :  { %1998 = vmatpush3.bf16.msra.mxu1 %v2220_v35  ;;  %1993 = vmatprep.subr.bf16.mxu0 %v2197_v28 }
 0x639   :  { %1999 = vmatprep.subr.bf16.mxu1 %v2093_v36  ;;  %1522 = vmatprep.mubr.f32.mxu0 %v2092_v3 }
 0x63a   :  { %1638 = vrot.lane.b32.xlu0 %v2337_v63, %s2097_s26  ;;  %1871 = vmatprep.mubr.msk.f32.mxu1 %vm2094_vm1, %v2092_v3 }
 0x63b   :  { %1995 = vmatpush1.bf16.msra.mxu0 %v2217_v34 }
 0x63c   :  { %2001 = vmatpush3.bf16.msra.mxu1 %v2235_v39 }
 0x6a8   :  { %v1642_v55 = vpop.permute.xlu0 %1641 }
 0x6ac   :  { %v1639_v56 = vpop.permute.xlu0 %1638 }
 0x709   :  { %v1346_v26 = vpop.f32.mrb[16].mxu0 }
 0x70a   :  { %v1422_v60 = vrot.slane %v1346_v26, 4  ;;  %v1417_v35 = vpop.f32.mrb[14].mxu1  ;;  %v1348_v61 = vpop.f32.mrb[17].mxu0 }
 0x70b   :  { %v1432_v28 = vrot.slane %v1348_v61, 4  ;;  %v1862_v12 = vpop.f32.mrb[15].mxu1  ;;  %v1441_v39 = vadd.f32 %v2273_v8, %v1417_v35  ;;  %v1657_v35 = vsel %vm73_vm0, %v2359_v25, %v1642_v55 }
 0x70c   :  { %v1424_v36 = vadd.f32 %v1422_v60, %v2258_v52 }
 0x70d   :  { %v1434_v0 = vadd.f32 %v1432_v28, %v2260_v54  ;;  %v1443_v5 = vrot.slane %v1441_v39, 4 }
 0x70e   :  { %v1721_v1 = vmul.f32 -1.442695, %v1424_v36 }
 0x70f   :  { %v1722_v2 = vmul.f32 -1.442695, %v1434_v0 }
 0x710   :  { %2068 = vpow2.f32 %v1721_v1 }
 0x711   :  { %2070 = vpow2.f32 %v1722_v2 }
 0x71a   :  { %v2069_v63 = vpop.eup %2068 }
 0x71b   :  { %v2071_v3 = vpop.eup %2070  ;;  %v1428_v4 = vadd.f32 1.0, %v2069_v63 }
 0x71c   :  { %v1438_v34 = vadd.f32 1.0, %v2071_v3 }
 0x71d   :  { %2072 = vrcp.f32 %v1428_v4 }
 0x71e   :  { %2074 = vrcp.f32 %v1438_v34 }
 0x727   :  { %v2073_v6 = vpop.eup %2072 }
 0x728   :  { %v2075_v9 = vpop.eup %2074  ;;  %v1445_v10 = vmul.f32 %v2073_v6, %v1443_v5 }
 0x729   :  { %v1452_v11 = vmul.f32 %v2075_v9, %v1450_v7  ;;  %v1448_v14 = vsub.f32 1.0, %v2075_v9 }
 0x72a   :  { %v1446_v13 = vadd.f32 %v1445_v10, %v2264_v57 }
 0x72c   :  { %2076 = vtanh.f32 %v1446_v13 }
 0x736   :  { %v2077_v15 = vpop.eup %2076 }
 0x737   :  { %v1449_v16 = vmul.f32 %v2077_v15, %v1448_v14 }
 0x739   :  { %v1453_v18 = vadd.f32 %v1452_v11, %v1449_v16 }
 0x73b   :  { %v1455_v19 = vrot.slane %v1453_v18, 4  ;;  %v1628_v44 = vrot.slane %v1453_v18, 6 }
 0x73d   :  { %1644 = vrot.lane.b32.xlu1 %v1455_v19, %s2096_s25  ;;  %1723 = vmatmul.mubr.msk.f32.vlgmr.msra.gmra.mrb[18].mxu0 %vm73_vm0, %v1455_v19 }
 0x73e   :  { %1872 = vmatmul.mubr.msk.f32.vlgmr.msra.gmra.mrb[16].mxu1 %vm73_vm0, %v1455_v19 }
 0x810   :  { %v1524_v20 = vpop.f32.mrb[18].mxu0 }
 0x811   :  { %v1600_v22 = vrot.slane %v1524_v20, 2  ;;  %v1595_v23 = vpop.f32.mrb[16].mxu1  ;;  %v1526_v24 = vpop.f32.mrb[19].mxu0 }
 0x812   :  { %v1610_v27 = vrot.slane %v1526_v24, 2  ;;  %v1873_v29 = vpop.f32.mrb[17].mxu1  ;;  %v1619_v42 = vadd.f32 %v2273_v8, %v1595_v23  ;;  %v1636_v8 = vpop.permute.xlu1 %1635 }
 0x813   :  { %v1602_v30 = vadd.f32 %v1600_v22, %v2258_v52  ;;  %v1654_v58 = vsel %vm1653_vm2, %v1652_v62, %v1636_v8 }
 0x814   :  { %v1612_v31 = vadd.f32 %v1610_v27, %v2260_v54  ;;  %v1621_v43 = vrot.slane %v1619_v42, 2  ;;  %v1656_v59 = vsel %vm1655_vm3, %v1654_v58, %v1639_v56 }
 0x815   :  { %v1725_v32 = vmul.f32 -1.442695, %v1602_v30 }
 0x816   :  { %v1726_v33 = vmul.f32 -1.442695, %v1612_v31  ;;  %v1645_v26 = vpop.permute.xlu1 %1644 }
 0x817   :  { %2078 = vpow2.f32 %v1725_v32  ;;  %v1658_v28 = vsel %vm1653_vm2, %v1657_v35, %v1645_v26 }
 0x818   :  { %2080 = vpow2.f32 %v1726_v33 }
 0x821   :  { %v2079_v37 = vpop.eup %2078 }
 0x822   :  { %v2081_v38 = vpop.eup %2080  ;;  %v1606_v40 = vadd.f32 1.0, %v2079_v37 }
 0x823   :  { %v1616_v41 = vadd.f32 1.0, %v2081_v38 }
 0x824   :  { %2082 = vrcp.f32 %v1606_v40 }
 0x825   :  { %2084 = vrcp.f32 %v1616_v41 }
 0x82e   :  { %v2083_v17 = vpop.eup %2082 }
 0x82f   :  { %v2085_v45 = vpop.eup %2084  ;;  %v1623_v46 = vmul.f32 %v2083_v17, %v1621_v43 }
 0x830   :  { %v1630_v52 = vmul.f32 %v2085_v45, %v1628_v44  ;;  %v1626_v47 = vsub.f32 1.0, %v2085_v45 }
 0x831   :  { %v1624_v54 = vadd.f32 %v1623_v46, %v2264_v57  ;;  %v1727_v57 = vld.sshfl [vmem:[%s2422_s1] sm:$0x33 pattern:$0x76325410] }
 0x832   :  { %v1669_v60 = vcombine.high %v1727_v57, %v1727_v57  ;;  %v1672_v61 = vadd.f32 %v1727_v57, %v1656_v59 }
 0x833   :  { %2086 = vtanh.f32 %v1624_v54 }
 0x834   :  { %2088 = vtanh.f32 %v1672_v61 }
 0x83d   :  { %v2087_v48 = vpop.eup %2086 }
 0x83e   :  { %v1627_v49 = vmul.f32 %v2087_v48, %v1626_v47  ;;  %v2089_v1 = vpop.eup %2088 }
 0x840   :  { %v1631_v50 = vadd.f32 %v1630_v52, %v1627_v49 }
 0x842   :  { %v1648_v51 = vrot.slane %v1631_v50, 6 }
 0x844   :  { %1649 = vrot.lane.b32.xlu1 %v1648_v51, %s2097_s26 }
 0x8b6   :  { %v1650_v12 = vpop.permute.xlu1 %1649 }
 0x8b7   :  { %v1659_v36 = vsel %vm1655_vm3, %v1658_v28, %v1650_v12 }
 0x8b8   :  { %v1673_v0 = vadd.f32 %v1669_v60, %v1659_v36 }
 0x8ba   :  { %2090 = vtanh.f32 %v1673_v0 }
 0x8c4   :  { %v2091_v21 = vpop.eup %2090 }
 0x8c5   :  { %v1678_v2 = vcombine.low %v2089_v1, %v2091_v21 }
 0x8c7   :  { %1728 = vst.sshfl [vmem:[%s2423_s6] sm:$0x33 pattern:$0x76325410] %v1678_v2 }

</bundles_post_ra>
